<compile_context>
chip_gen: v6e
topology: v6e:2x2x1
jax: 0.10.0
libtpu: 0.0.40
codegen_flags: <defaults>
</compile_context>

<pallas_src>
import functools
import math

import jax
import jax.numpy as jnp
from jax.experimental import pallas as pl
from jax.experimental.pallas import tpu as pltpu

LANE = 128
MAX_TILE_R = 1024   # 1024 rows * 128 lanes * 4 B = 512 KiB per f32 input block


def _binary_metrics_kernel(pred_ref, true_ref, out_ref, acc_ref, *,
                           L, tile_r, sub, need_mask, activation):
    j = pl.program_id(1)
    kt = pl.num_programs(1)

    @pl.when(j == 0)
    def _init():
        acc_ref[...] = jnp.zeros_like(acc_ref)

    pred = pred_ref[0].astype(jnp.float32)   # (tile_r, 128)
    gt = true_ref[0].astype(jnp.float32)     # (tile_r, 128)

    # static (trace-time) activation selection, matching the torch forward()
    if activation in (None, "none"):
        act = (pred > 0.5).astype(jnp.float32)
    elif activation == "sigmoid":
        act = jax.nn.sigmoid(pred)
    elif activation == "sigmoid_with_reshold":
        act = (jax.nn.sigmoid(pred) > 0.5).astype(jnp.float32)
    else:
        raise ValueError(f"activation {activation} not supported!")

    tp_v = gt * act   # per-element y_true * act
    a_v = gt          # per-element y_true
    b_v = act         # per-element act

    if need_mask:
        # mask handles (a) the lane tail when L % 128 != 0 and (b) garbage rows
        # in a partial last row-tile when R % tile_r != 0.
        row = jax.lax.broadcasted_iota(jnp.int32, (tile_r, LANE), 0)
        lane = jax.lax.broadcasted_iota(jnp.int32, (tile_r, LANE), 1)
        elem = (j * tile_r + row) * LANE + lane
        valid = elem < L
        zero = jnp.float32(0.0)
        tp_v = jnp.where(valid, tp_v, zero)
        a_v = jnp.where(valid, a_v, zero)
        b_v = jnp.where(valid, b_v, zero)

    # Fold tile rows into the accumulator sublanes.  When tile_r % 8 == 0 this is
    # a vreg-aligned reshape + elementwise adds (pure VPU, no XLU per step).
    if sub == 1:
        fold = lambda v: jnp.sum(v, axis=0, keepdims=True)
    else:
        fold = lambda v: jnp.sum(v.reshape(tile_r // sub, sub, LANE), axis=0)

    acc_ref[0] += fold(tp_v)
    acc_ref[1] += fold(a_v)
    acc_ref[2] += fold(b_v)

    @pl.when(j == kt - 1)
    def _write():
        # per-sample vector partials; cross-lane reduction happens outside.
        out_ref[0] = acc_ref[...]


def binary_metrics(y_pred, y_true, eps=1e-05, activation="none"):
    """Pallas equivalent of BinaryMetrics(eps, activation)(y_pred, y_true).

    Returns a list of 8 scalar float32 arrays:
      [pixel_acc, dice, precision, specificity, recall, iou, tpr, fpr]
    """
    assert y_pred.shape == y_true.shape and y_pred.ndim == 4
    N = y_pred.shape[0]
    L = int(math.prod(y_pred.shape[1:]))
    R = pl.cdiv(L, LANE)
    pad = R * LANE - L

    # keep native dtypes — widening happens per-tile inside the kernel
    pred_flat = y_pred.reshape(N, L)
    true_flat = y_true.reshape(N, L)
    if pad:
        # rare ragged-lane case only; padded elements are masked out in-kernel,
        # so zero padding is fine for every activation / dtype.
        pred_flat = jnp.pad(pred_flat, ((0, 0), (0, pad)))
        true_flat = jnp.pad(true_flat, ((0, 0), (0, pad)))
    pred3 = pred_flat.reshape(N, R, LANE)
    true3 = true_flat.reshape(N, R, LANE)

    tile_r = R if R <= MAX_TILE_R else MAX_TILE_R      # full dim or multiple of 8
    kt = pl.cdiv(R, tile_r)
    sub = 8 if tile_r % 8 == 0 else 1
    need_mask = (pad > 0) or (R % tile_r != 0)

    kernel = functools.partial(
        _binary_metrics_kernel,
        L=L, tile_r=tile_r, sub=sub, need_mask=need_mask, activation=activation)

    bytes_in = N * R * LANE * (y_pred.dtype.itemsize + y_true.dtype.itemsize)
    bytes_out = N * 3 * sub * LANE * 4
    transc = N * L if activation in ("sigmoid", "sigmoid_with_reshold") else 0

    part = pl.pallas_call(
        kernel,
        out_shape=jax.ShapeDtypeStruct((N, 3, sub, LANE), jnp.float32),
        grid_spec=pltpu.PrefetchScalarGridSpec(
            num_scalar_prefetch=0,
            grid=(N, kt),
            in_specs=[
                pl.BlockSpec((1, tile_r, LANE), lambda i, j: (i, j, 0)),
                pl.BlockSpec((1, tile_r, LANE), lambda i, j: (i, j, 0)),
            ],
            out_specs=pl.BlockSpec((1, 3, sub, LANE), lambda i, j: (i, 0, 0, 0)),
            scratch_shapes=[pltpu.VMEM((3, sub, LANE), jnp.float32)],
        ),
        compiler_params=pltpu.CompilerParams(
            # batch axis is megacore-shardable (v7x); inner row-tile axis carries
            # the per-sample accumulator.
            dimension_semantics=("parallel", "arbitrary")),
        cost_estimate=pl.CostEstimate(
            flops=6 * N * L,
            transcendentals=transc,
            bytes_accessed=bytes_in + bytes_out),
    )(pred3, true3)

    # trivial combine in plain JAX (tiny (N, 3, sub, 128) tensor)
    sums = jnp.sum(part, axis=(2, 3))            # (N, 3)
    tp_n = sums[:, 0]                            # per-sample sum(y_true * act)
    a_n = sums[:, 1]                             # per-sample sum(y_true)
    b_n = sums[:, 2]                             # per-sample sum(act)

    tp = jnp.sum(tp_n)
    a = jnp.sum(a_n)
    b = jnp.sum(b_n)
    total = jnp.float32(N * L)
    fp = a - tp                                  # sum(y_true * (1 - act))
    fn = b - tp                                  # sum((1 - y_true) * act)
    tn = total - a - b + tp                      # sum((1 - y_true) * (1 - act))

    pixel_acc = (tp + tn + eps) / (tp + tn + fp + fn + eps)
    dice = (2.0 * tp + eps) / (2.0 * tp + fp + fn + eps)
    precision = (tp + eps) / (tp + fp + eps)
    specificity = (tn + eps) / (tn + fp + eps)
    recall = (tp + eps) / (tp + fn + eps)
    iou = jnp.mean((tp_n + eps) / (a_n + b_n - tp_n + eps))
    tpr = tp / (tp + fn + eps)
    fpr = fn / (fn + tn + eps)
    return [pixel_acc, dice, precision, specificity, recall, iou, tpr, fpr]


def _reference(y_pred, y_true, eps=1e-05):
    """Pure-JAX port of the torch module (activation='none') for verification."""
    act = (y_pred > 0.5).astype(jnp.float32)
    output = y_true.reshape(-1).astype(jnp.float32)   # torch passes (y_true, act)
    target = act.reshape(-1)
    tp = jnp.sum(output * target)
    fp = jnp.sum(output * (1.0 - target))
    fn = jnp.sum((1.0 - output) * target)
    tn = jnp.sum((1.0 - output) * (1.0 - target))
    pixel_acc = (tp + tn + eps) / (tp + tn + fp + fn + eps)
    dice = (2 * tp + eps) / (2 * tp + fp + fn + eps)
    precision = (tp + eps) / (tp + fp + eps)
    recall = (tp + eps) / (tp + fn + eps)
    specificity = (tn + eps) / (tn + fp + eps)
    tpr = tp / (tp + fn + eps)
    fpr = fn / (fn + tn + eps)
    inter = jnp.sum(y_true * act, axis=(1, 2, 3))
    union = jnp.sum(y_true, axis=(1, 2, 3)) + jnp.sum(act, axis=(1, 2, 3))
    iou = jnp.mean((inter + eps) / (union - inter + eps))
    return [pixel_acc, dice, precision, specificity, recall, iou, tpr, fpr]


if __name__ == "__main__":
    key = jax.random.PRNGKey(0)
    k1, k2 = jax.random.split(key)
    # small NCHW shapes: batch=2, channels=4, spatial=16x16
    y_pred = jax.random.uniform(k1, (2, 4, 16, 16), dtype=jnp.float32)
    y_true = (jax.random.uniform(k2, (2, 4, 16, 16)) > 0.5).astype(jnp.float32)

    metrics = binary_metrics(y_pred, y_true, eps=1e-05, activation="none")
    metrics = [jax.block_until_ready(m) for m in metrics]

    ref = _reference(y_pred, y_true, eps=1e-05)
    for got, want in zip(metrics, ref):
        assert jnp.allclose(got, want, rtol=1e-5, atol=1e-5), (got, want)

    print("KERNEL_OK")
</pallas_src>

<mosaic_0001>
module attributes {stable_mosaic.version = 11 : i64} {
  func.func @_binary_metrics_kernel(%arg0: i32, %arg1: i32, %arg2: memref<1x8x128xf32, #tpu.memory_space<vmem>>, %arg3: memref<1x8x128xf32, #tpu.memory_space<vmem>>, %arg4: memref<1x3x8x128xf32, #tpu.memory_space<vmem>>, %arg5: memref<3x8x128xf32, #tpu.memory_space<vmem>>) attributes {dimension_semantics = [#tpu.dimension_semantics<parallel>, #tpu.dimension_semantics<arbitrary>], iteration_bounds = array<i64: 2, 1>, scalar_prefetch = 0 : i64, scratch_operands = 1 : i64, tpu.core_type = #tpu.core_type<tc>, window_params = [{transform_indices = @transform_0, window_bounds = array<i64: 1, 8, 128>}, {transform_indices = @transform_1, window_bounds = array<i64: 1, 8, 128>}, {transform_indices = @transform_2, window_bounds = array<i64: 1, 3, 8, 128>}]} {
    %c0_i32 = arith.constant 0 : i32
    %0 = arith.cmpi eq, %arg1, %c0_i32 : i32
    %1 = arith.extui %0 : i1 to i32
    %c0_i32_0 = arith.constant 0 : i32
    %2 = arith.cmpi ne, %1, %c0_i32_0 : i32
    scf.if %2 {
      %cst_27 = arith.constant 0.000000e+00 : f32
      %39 = vector.broadcast %cst_27 : f32 to vector<3x8x128xf32>
      %c0_28 = arith.constant 0 : index
      %c0_29 = arith.constant 0 : index
      %c0_30 = arith.constant 0 : index
      %40 = vector.load %arg5[%c0_28, %c0_29, %c0_30] : memref<3x8x128xf32, #tpu.memory_space<vmem>>, vector<3x8x128xf32>
      tpu.vector_store %arg5[%c0_28, %c0_29, %c0_30], %39 {strides = array<i32>} : memref<3x8x128xf32, #tpu.memory_space<vmem>>, vector<3x8x128xf32>,
    } else {
    }
    %c0 = arith.constant 0 : index
    %c0_1 = arith.constant 0 : index
    %c0_2 = arith.constant 0 : index
    %3 = vector.load %arg2[%c0, %c0_1, %c0_2] : memref<1x8x128xf32, #tpu.memory_space<vmem>>, vector<1x8x128xf32>
    %4 = vector.shape_cast %3 : vector<1x8x128xf32> to vector<8x128xf32>
    %c0_3 = arith.constant 0 : index
    %c0_4 = arith.constant 0 : index
    %c0_5 = arith.constant 0 : index
    %5 = vector.load %arg3[%c0_3, %c0_4, %c0_5] : memref<1x8x128xf32, #tpu.memory_space<vmem>>, vector<1x8x128xf32>
    %6 = vector.shape_cast %5 : vector<1x8x128xf32> to vector<8x128xf32>
    %cst = arith.constant 5.000000e-01 : f32
    %7 = vector.broadcast %cst : f32 to vector<8x128xf32>
    %8 = arith.cmpf ogt, %4, %7 : vector<8x128xf32>
    %9 = arith.extui %8 : vector<8x128xi1> to vector<8x128xi32>
    %10 = arith.sitofp %9 : vector<8x128xi32> to vector<8x128xf32>
    %11 = arith.mulf %6, %10 : vector<8x128xf32>
    %c0_6 = arith.constant 0 : index
    %c0_7 = arith.constant 0 : index
    %c0_8 = arith.constant 0 : index
    %12 = vector.load %arg5[%c0_6, %c0_7, %c0_8] : memref<3x8x128xf32, #tpu.memory_space<vmem>>, vector<1x8x128xf32>
    %13 = vector.shape_cast %12 : vector<1x8x128xf32> to vector<8x128xf32>
    %14 = vector.shape_cast %11 : vector<8x128xf32> to vector<1x8x128xf32>
    %cst_9 = arith.constant dense<0.000000e+00> : vector<8x128xf32>
    %15 = vector.multi_reduction <add>, %14, %cst_9 [0] : vector<1x8x128xf32> to vector<8x128xf32>
    %16 = arith.addf %13, %15 : vector<8x128xf32>
    %c0_10 = arith.constant 0 : index
    %c0_11 = arith.constant 0 : index
    %c0_12 = arith.constant 0 : index
    %17 = vector.load %arg5[%c0_10, %c0_11, %c0_12] : memref<3x8x128xf32, #tpu.memory_space<vmem>>, vector<1x8x128xf32>
    %18 = vector.shape_cast %17 : vector<1x8x128xf32> to vector<8x128xf32>
    %19 = vector.shape_cast %16 : vector<8x128xf32> to vector<1x8x128xf32>
    tpu.vector_store %arg5[%c0_10, %c0_11, %c0_12], %19 {strides = array<i32>} : memref<3x8x128xf32, #tpu.memory_space<vmem>>, vector<1x8x128xf32>,
    %c1 = arith.constant 1 : index
    %c0_13 = arith.constant 0 : index
    %c0_14 = arith.constant 0 : index
    %20 = vector.load %arg5[%c1, %c0_13, %c0_14] : memref<3x8x128xf32, #tpu.memory_space<vmem>>, vector<1x8x128xf32>
    %21 = vector.shape_cast %20 : vector<1x8x128xf32> to vector<8x128xf32>
    %22 = vector.shape_cast %6 : vector<8x128xf32> to vector<1x8x128xf32>
    %cst_15 = arith.constant dense<0.000000e+00> : vector<8x128xf32>
    %23 = vector.multi_reduction <add>, %22, %cst_15 [0] : vector<1x8x128xf32> to vector<8x128xf32>
    %24 = arith.addf %21, %23 : vector<8x128xf32>
    %c1_16 = arith.constant 1 : index
    %c0_17 = arith.constant 0 : index
    %c0_18 = arith.constant 0 : index
    %25 = vector.load %arg5[%c1_16, %c0_17, %c0_18] : memref<3x8x128xf32, #tpu.memory_space<vmem>>, vector<1x8x128xf32>
    %26 = vector.shape_cast %25 : vector<1x8x128xf32> to vector<8x128xf32>
    %27 = vector.shape_cast %24 : vector<8x128xf32> to vector<1x8x128xf32>
    tpu.vector_store %arg5[%c1_16, %c0_17, %c0_18], %27 {strides = array<i32>} : memref<3x8x128xf32, #tpu.memory_space<vmem>>, vector<1x8x128xf32>,
    %c2 = arith.constant 2 : index
    %c0_19 = arith.constant 0 : index
    %c0_20 = arith.constant 0 : index
    %28 = vector.load %arg5[%c2, %c0_19, %c0_20] : memref<3x8x128xf32, #tpu.memory_space<vmem>>, vector<1x8x128xf32>
    %29 = vector.shape_cast %28 : vector<1x8x128xf32> to vector<8x128xf32>
    %30 = vector.shape_cast %10 : vector<8x128xf32> to vector<1x8x128xf32>
    %cst_21 = arith.constant dense<0.000000e+00> : vector<8x128xf32>
    %31 = vector.multi_reduction <add>, %30, %cst_21 [0] : vector<1x8x128xf32> to vector<8x128xf32>
    %32 = arith.addf %29, %31 : vector<8x128xf32>
    %c2_22 = arith.constant 2 : index
    %c0_23 = arith.constant 0 : index
    %c0_24 = arith.constant 0 : index
    %33 = vector.load %arg5[%c2_22, %c0_23, %c0_24] : memref<3x8x128xf32, #tpu.memory_space<vmem>>, vector<1x8x128xf32>
    %34 = vector.shape_cast %33 : vector<1x8x128xf32> to vector<8x128xf32>
    %35 = vector.shape_cast %32 : vector<8x128xf32> to vector<1x8x128xf32>
    tpu.vector_store %arg5[%c2_22, %c0_23, %c0_24], %35 {strides = array<i32>} : memref<3x8x128xf32, #tpu.memory_space<vmem>>, vector<1x8x128xf32>,
    %c0_i32_25 = arith.constant 0 : i32
    %36 = arith.cmpi eq, %arg1, %c0_i32_25 : i32
    %37 = arith.extui %36 : i1 to i32
    %c0_i32_26 = arith.constant 0 : i32
    %38 = arith.cmpi ne, %37, %c0_i32_26 : i32
    scf.if %38 {
      %c0_27 = arith.constant 0 : index
      %c0_28 = arith.constant 0 : index
      %c0_29 = arith.constant 0 : index
      %39 = vector.load %arg5[%c0_27, %c0_28, %c0_29] : memref<3x8x128xf32, #tpu.memory_space<vmem>>, vector<3x8x128xf32>
      %c0_30 = arith.constant 0 : index
      %c0_31 = arith.constant 0 : index
      %c0_32 = arith.constant 0 : index
      %c0_33 = arith.constant 0 : index
      %40 = vector.load %arg4[%c0_30, %c0_31, %c0_32, %c0_33] : memref<1x3x8x128xf32, #tpu.memory_space<vmem>>, vector<1x3x8x128xf32>
      %41 = vector.shape_cast %40 : vector<1x3x8x128xf32> to vector<3x8x128xf32>
      %42 = vector.shape_cast %39 : vector<3x8x128xf32> to vector<1x3x8x128xf32>
      tpu.vector_store %arg4[%c0_30, %c0_31, %c0_32, %c0_33], %42 {strides = array<i32>} : memref<1x3x8x128xf32, #tpu.memory_space<vmem>>, vector<1x3x8x128xf32>,
    } else {
    }
    return
  }
  func.func @transform_0(%arg0: i32, %arg1: i32) -> (i32, i32, i32) {
    %c0_i32 = arith.constant 0 : i32
    %c0_i32_0 = arith.constant 0 : i32
    return %arg0, %arg1, %c0_i32 : i32, i32, i32
  }
  func.func @transform_1(%arg0: i32, %arg1: i32) -> (i32, i32, i32) {
    %c0_i32 = arith.constant 0 : i32
    %c0_i32_0 = arith.constant 0 : i32
    return %arg0, %arg1, %c0_i32 : i32, i32, i32
  }
  func.func @transform_2(%arg0: i32, %arg1: i32) -> (i32, i32, i32, i32) {
    %c0_i32 = arith.constant 0 : i32
    %c0_i32_0 = arith.constant 0 : i32
    %c0_i32_1 = arith.constant 0 : i32
    %c0_i32_2 = arith.constant 0 : i32
    return %arg0, %c0_i32, %c0_i32_0, %c0_i32_1 : i32, i32, i32, i32
  }
}

</mosaic_0001>

<bundles_post_ra>
// kernel: tpu_custom_call.1
= control target key start
LH: loop header
LB: loop body
LE: loop exit
PB: predicated region body
PF: predicated region fallthrough
CT: control target
= control target key end

     0   :  { %7 = vsyncpa [#allocation4], 0  ;;  %s796_s0 = inlined_call_operand.hbm [shape: f32[2,8,128], index: 0, kind: input, shape index: {}]   ;;  %s797_s1 = inlined_call_operand.hbm [shape: f32[2,8,128], index: 1, kind: input, shape index: {}]   ;;  %s798_s2 = inlined_call_operand.hbm [shape: f32[2,3,8,128], index: 2, kind: output, shape index: {}]  }
   0x1   :  { %9 = vsyncpa [#allocation4 + $0x1], 0 }
   0x2   :  { %10 = vsyncpa [#allocation7], 0 }
   0x3   :  { %12 = vsyncpa [#allocation7 + $0x1], 0 }
   0x4   :  { %13 = vsyncpa [#allocation5], 0 }
   0x5   :  { %15 = vsyncpa [#allocation5 + $0x1], 0  ;;  %s620_s9 = smov 0   ;;  %s622_s10 = smov 0  }
   0x6   :  { %s624_s11 = smov 0   ;;  %s626_s12 = smov 0  }
   0x7   :  { %s628_s13 = smov 0   ;;  %s630_s14 = smov 0  }
   0x8 LB: > { %s370_s15 = sadd.s32 4294967295, %s597_s14   ;;  %s371_s16 = sadd.s32 4294967294, %s597_s14   ;;  %s597_s14 = sphi %s630_s14, %s21_s14   ;;  %s593_s13 = sphi %s628_s13, %s810_s13   ;;  %s589_s12 = sphi %s626_s12, %s809_s12   ;;  %s585_s11 = sphi %s624_s11, %s808_s11   ;;  %s581_s10 = sphi %s622_s10, %s807_s10   ;;  %s577_s9 = sphi %s620_s9, %s806_s9  }
   0x9   : > { %s33_s17 = sadd.s32 1, %s593_s13  ;;  %s42_s18 = sadd.s32 1, %s585_s11 }
   0xa   : > { %p35_p0 = scmp.ge.s32.totalorder %s33_s17, 2  ;;  %p49_p1 = scmp.ne.s32.totalorder %s585_s11, %s581_s10 }
   0xb   : > { %p50_p2 = scmp.eq.s32.totalorder %s597_s14, 0  ;;  %p55_p3 = scmp.ne.s32.totalorder %s581_s10, %s577_s9 }
   0xc   : > { %s812_s17 = smov (%p35_p0, %s33_s17), 0  ;;  %p56_p5 = scmp.eq.s32.totalorder %s370_s15, 0 }
   0xd   : > { %p661_p4 = por %p50_p2, %p49_p1  ;;  %s37_s20 = ssub.s32 %s593_s13, %s812_s17 }
   0xe   : > { %p107_p6 = scmp.eq.s32.totalorder %s370_s15, 1  ;;  %p40_p7 = scmp.eq.s32.totalorder %s37_s20, 0 }
   0xf   : > { %p667_p8 = por %p56_p5, %p55_p3  ;;  %p113_p10 = scmp.eq.s32.totalorder %s371_s16, 1 }
  0x10   : > { %p671_p9 = por %p107_p6, %p49_p1  ;;  %p404_p13 = scmp.lt.s32.totalorder %s597_s14, 2 }
  0x11   : > { %s676_s23 = scalar_select %p40_p7, %s585_s11, %s42_s18  }
  0x12   : > { %p678_p11 = por %p113_p10, %p55_p3  ;;  %s685_s25 = sand.u32 1, %s585_s11  }
  0x13   : > { %s374_s26 = sshll.u32 %s685_s25, 3  ;;  %s375_s27 = sshll.u32 %s593_s13, 7 }
  0x14   : > { %s143_s30 = scalar_lea.hbm %s796_s0, %s375_s27  ;;  %s137_s3 = scalar_lea.vmem [#allocation3], %s374_s26 }
  0x15   : > { %s145_s4 = sshll.u32 %s137_s3, 4  ;;  %p694_p0 = pnand %p404_p13, %p661_p4  ;;  %s146_s4 = int_to_ptr.vmem [resolvable:$true] %s145_s4 }
  0x16   : > { %p378_p1 = scmp.ge.s32.totalorder %s597_s14, 1  ;;  %p169_p2 = scmp.lt.s32.totalorder %s597_s14, 3 }
  0x17   : > { %s134_s6 = scalar_lea.sflag [#allocation4], %s685_s25  ;;  %p459_p3 = pneg %p694_p0 }
  0x18   : > { %s470_s7 = scalar_lea.vmem %s146_s4, 128  ;;  %s599_s8 = smov [#allocation3]  }
  0x19   : > { %p471_p5 = scmp.ne.s32.totalorder %s146_s4, %s470_s7  ;;  %s475_s15 = sshll.u32 %s599_s8, 4  ;;  %s476_s15 = int_to_ptr.vmem [resolvable:$false] %s475_s15 }
  0x1a   : > { %s477_s16 = scalar_lea.vmem %s476_s15, 256  ;;  %p478_p4 = scmp.lt.s32.totalorder %s146_s4, %s476_s15 }
  0x1b   : > { %p473_p6 = pnand %p471_p5, %p459_p3  ;;  %p479_p10 = scmp.lt.s32.totalorder %s477_s16, %s470_s7 }
  0x1d   : > { %p474_p7 = pneg %p473_p6  ;;  %p480_p13 = por %p479_p10, %p478_p4 }
  0x1f   : > { %p481_p12 = pnand %p480_p13, %p474_p7 }
  0x21   : > { %484 = shalt.err (!%p481_p12)
}
  0x22   : > { %396 = dma.hbm_to_vmem [thread:$0]  (!%p694_p0), %s143_s30, 128, %s146_s4, %s134_s6  }
  0x23   : > { %p712_p5 = pnand %p378_p1, %p169_p2  ;;  %s162_s28 = scalar_lea.hbm %s797_s1, %s375_s27 }
  0x24   : > { %s156_s29 = scalar_lea.vmem [#allocation6], %s374_s26  ;;  %s153_s7 = scalar_lea.sflag [#allocation7], %s685_s25 }
  0x25   : > { %s164_s3 = sshll.u32 %s156_s29, 4  ;;  %s600_s30 = smov [#allocation6]   ;;  %s165_s3 = int_to_ptr.vmem [resolvable:$true] %s164_s3 }
  0x26   : > { %s498_s8 = scalar_lea.vmem %s165_s3, 128  ;;  %s503_s4 = sshll.u32 %s600_s30, 4  ;;  %s504_s4 = int_to_ptr.vmem [resolvable:$false] %s503_s4 }
  0x27   : > { %p499_p12 = scmp.ne.s32.totalorder %s165_s3, %s498_s8  ;;  %s505_s6 = scalar_lea.vmem %s504_s4, 256 }
  0x28   : > { %p506_p1 = scmp.lt.s32.totalorder %s165_s3, %s504_s4  ;;  %p507_p2 = scmp.lt.s32.totalorder %s505_s6, %s498_s8 }
  0x29   : > { %p501_p6 = pnand %p499_p12, %p459_p3 }
  0x2a   : > { %p508_p4 = por %p507_p2, %p506_p1 }
  0x2b   : > { %p502_p7 = pneg %p501_p6 }
  0x2d   : > { %p509_p10 = pnand %p508_p4, %p502_p7 }
  0x2f   : > { %512 = shalt.err (!%p509_p10)
}
  0x30   : > { %399 = dma.hbm_to_vmem [thread:$0]  (!%p694_p0), %s162_s28, 128, %s165_s3, %s153_s7  }
  0x31   : > { %173 = sbr.rel (%p712_p5) target bundleno = 83 (0x53), region = 28  ;;  %s728_s25 = sand.u32 (!%p712_p5), 1, %s581_s10  }
  0x32   : > { %s379_s26 = sshll.u32 (!%p712_p5), %s728_s25, 3  ;;  %s176_s27 = scalar_lea.sflag (!%p712_p5), [#allocation4], %s728_s25 }
  0x33   : > { %s179_s15 = scalar_lea.vmem (!%p712_p5), [#allocation3], %s379_s26 }
  0x36   : > { %564 = dma.done.wait (%p667_p8), %s176_s27, 128  }
  0x37   : > { %566 = vsyncadd (%p667_p8), %s176_s27, 4294967168  ;;  %s185_s5 = scalar_lea.sflag [#allocation7], %s728_s25  ;;  %s188_s16 = scalar_lea.vmem [#allocation6], %s379_s26 }
  0x38   : > { %568 = dma.done.wait (%p667_p8), %s185_s5, 128  }
  0x39   : > { %570 = vsyncadd (%p667_p8), %s185_s5, 4294967168  ;;  %s385_s18 = smul.u32 24, %s728_s25  ;;  %v221_v0 = vld [vmem:[%s179_s15] sm:$0xff]  ;;  %v222_v1 = vld [vmem:[%s188_s16] sm:$0xff]  ;;  %v601_v2 = vmov 0.0   ;;  %s251_s3 = scalar_lea.sflag [#allocation5], %s728_s25 }
  0x3a   : > { %s386_s19 = smul.u32 384, %s589_s12  ;;  %vm223_vm0 = vcmp.gt.f32.partialorder %v221_v0, 0.5  ;;  %s602_s8 = smov [#allocation8]  }
  0x3b   : > { %s213_s20 = scalar_lea.vmem [#allocation8], %s385_s18  ;;  %v381_v3 = vsel %vm223_vm0, 1.0, %v601_v2  ;;  %s517_s30 = sshll.u32 %s602_s8, 4  ;;  %s518_s30 = int_to_ptr.vmem [resolvable:$false] %s517_s30 }
  0x3c   : > { %s264_s28 = sshll.u32 %s213_s20, 4  ;;  %248 = vst [vmem:[%s213_s20 + $0x8] sm:$0xff] %v222_v1  ;;  %v226_v4 = vmul.f32 %v381_v3, %v222_v1  ;;  %249 = vst [vmem:[%s213_s20 + $0x10] sm:$0xff] %v381_v3  ;;  %s748_s12 = scalar_lea.hbm %s798_s2, %s386_s19  ;;  %s743_s28 = int_to_ptr.vmem [resolvable:$true] %s264_s28 }
  0x3d   : > { %s513_s7 = scalar_lea.vmem %s743_s28, 384  ;;  %s519_s4 = scalar_lea.vmem %s518_s30, 768 }
  0x3e   : > { %247 = vst [vmem:[%s213_s20] sm:$0xff] %v226_v4  ;;  %p514_p8 = scmp.ne.s32.totalorder %s743_s28, %s513_s7  ;;  %p520_p13 = scmp.lt.s32.totalorder %s743_s28, %s518_s30 }
  0x3f   : > { %p521_p5 = scmp.lt.s32.totalorder %s519_s4, %s513_s7 }
  0x40   : > { %p515_p0 = pnand %p514_p8, %p671_p9 }
  0x41   : > { %p522_p12 = por %p521_p5, %p520_p13 }
  0x42   : > { %p516_p3 = pneg %p515_p0 }
  0x44   : > { %p523_p6 = pnand %p522_p12, %p516_p3 }
  0x46   : > { %526 = shalt.err (!%p523_p6)
}
  0x47   : > { %s527_s6 = scalar_lea.hbm %s748_s12, 384  ;;  %s531_s15 = scalar_lea.hbm %s798_s2, 768 }
  0x48   : > { %p528_p7 = scmp.ne.s32.totalorder %s748_s12, %s527_s6  ;;  %p532_p4 = scmp.lt.s32.totalorder %s748_s12, %s798_s2 }
  0x49   : > { %p533_p10 = scmp.lt.s32.totalorder %s531_s15, %s527_s6 }
  0x4a   : > { %p529_p1 = pnand %p528_p7, %p671_p9 }
  0x4b   : > { %p534_p8 = por %p533_p10, %p532_p4 }
  0x4c   : > { %p530_p2 = pneg %p529_p1 }
  0x4e   : > { %p535_p0 = pnand %p534_p8, %p530_p2 }
  0x50   : > { %538 = shalt.err (!%p535_p0)
}
  0x51   : > { %s603_s18 = smov 128   ;;  %s604_s19 = smov 8  }
  0x52   : > { %391 = dma.vmem_to_hbm [thread:$0]  (%p671_p9), %s743_s28, 384, %s748_s12, %s251_s3, %s603_s18, %s603_s18, %s604_s19  }
  0x53 PF: > { %s279_s20 = sand.u32 1, %s577_s9   ;;  %p805_p3 = scmp.ge.s32.totalorder %s597_s14, 2 }
  0x54   : > { %s280_s21 = scalar_lea.sflag [#allocation5], %s279_s20 }
  0x55   : > { %p401_p13 = pnand %p805_p3, %p678_p11 }
  0x57   : > { %p402_p5 = pneg %p401_p13 }
  0x59   : > { %572 = dma.done.wait (%p402_p5), %s280_s21, 384  }
  0x5a   : > { %574 = vsyncadd (%p402_p5), %s280_s21, 4294966912  ;;  %s21_s14 = sadd.s32 1, %s597_s14   ;;  %s806_s9 = smov %s581_s10 }
  0x5b   : > { %p18_p12 = scmp.ge.s32.totalorder %s21_s14, 4   ;;  %s807_s10 = smov %s585_s11 }
  0x5c   : > { %s808_s11 = smov %s676_s23  ;;  %s809_s12 = smov %s593_s13 }
  0x5d   : > { %s810_s13 = smov %s812_s17  ;;  %20 = sbr.rel (!%p18_p12) target bundleno = 8 (0x8), region = 96 }
  0x62   :  { %285 = vsyncpa [#allocation4], 1 }
  0x63   :  { %287 = vsyncpa [#allocation4 + $0x1], 1 }
  0x64   :  { %288 = vsyncpa [#allocation7], 1 }
  0x65   :  { %290 = vsyncpa [#allocation7 + $0x1], 1 }
  0x66   :  { %291 = vsyncpa [#allocation5], 1 }
  0x67   :  { %293 = vsyncpa [#allocation5 + $0x1], 1 }

</bundles_post_ra>
